<compile_context>
chip_gen: v7x
topology: tpu7x:2x2x1
jax: 0.10.0
libtpu: 0.0.40
codegen_flags: <defaults>
</compile_context>

<pallas_src>
import functools

import numpy as np
import jax
import jax.numpy as jnp
from jax.experimental import pallas as pl
from jax.experimental.pallas import tpu as pltpu

_A = -0.75
_VMEM_BUDGET = 32 * 1024 * 1024   # target residency used for column-strip selection
_VMEM_LIMIT = 48 * 1024 * 1024    # scoped VMEM limit handed to Mosaic (fits v5e/v6e/v7x)


# ----------------------------------------------------------------------------
# Bicubic weight matrices (PyTorch upsample_bicubic2d convention), pad/crop fused.
# ----------------------------------------------------------------------------
def _bicubic_weight_matrix(in_size: int, out_size: int) -> np.ndarray:
    """(out_size, in_size) matrix matching torch interpolate(mode='bicubic',
    align_corners=False): A=-0.75, edge-clamped 4-tap."""

    def c1(x):  # |x| in [0, 1]
        return ((_A + 2.0) * x - (_A + 3.0)) * x * x + 1.0

    def c2(x):  # |x| in [1, 2]
        return ((_A * x - 5.0 * _A) * x + 8.0 * _A) * x - 4.0 * _A

    i = np.arange(out_size, dtype=np.float64)
    real = (in_size / out_size) * (i + 0.5) - 0.5
    base = np.floor(real).astype(np.int64)
    t = real - base
    coeffs = np.stack([c2(t + 1.0), c1(t), c1(1.0 - t), c2(2.0 - t)], axis=1)  # (out, 4)
    taps = np.clip(base[:, None] + np.arange(-1, 3)[None, :], 0, in_size - 1)  # (out, 4)
    mat = np.zeros((out_size, in_size), dtype=np.float32)
    np.add.at(mat, (np.arange(out_size)[:, None], taps), coeffs.astype(np.float32))
    return mat


def _padded_weight_matrix(in_size, resize_out, final_size, offset):
    """Resize matrix with F.pad / negative-pad crop fused: final index r reads resize index
    (r - offset); out-of-range rows are all-zero (fill handled by the wrapper)."""
    base = _bicubic_weight_matrix(in_size, resize_out)
    rows = np.arange(final_size) - offset
    valid = (rows >= 0) & (rows < resize_out)
    mat = np.zeros((final_size, in_size), dtype=np.float32)
    mat[valid] = base[rows[valid]]
    return mat, valid


@functools.lru_cache(maxsize=64)
def _get_weights(H, W, C, new_h, new_w, out_size, top, left):
    """Cached device bf16 weight matrices for a given (shape, resize, pad) configuration."""
    wh_np, valid_h = _padded_weight_matrix(H, new_h, out_size, top)    # (S, H)
    ww_np, valid_w = _padded_weight_matrix(W, new_w, out_size, left)   # (S, W)
    # Width pass runs on the flat (..., W*C) lane axis: kron with I_C keeps channels
    # interleaved, so the image never needs an HWC<->CHW transpose.
    wk_np = np.kron(ww_np.T, np.eye(C, dtype=np.float32))              # (W*C, S*C)
    wh = jnp.asarray(wh_np, dtype=jnp.bfloat16)
    wk = jnp.asarray(wk_np, dtype=jnp.bfloat16)
    return wh, wk, valid_h, valid_w


# ----------------------------------------------------------------------------
# Pallas kernel: height pass once into VMEM scratch, width pass per column strip.
# ----------------------------------------------------------------------------
def _resize_kernel(x_ref, wh_ref, wk_ref, o_ref, tmp_ref):
    # x_ref:  (H, W*C) bf16      wh_ref: (S, H) bf16
    # wk_ref: (W*C, TN) bf16     o_ref:  (S, TN) out-dtype
    # tmp_ref: (S, W*C) bf16 scratch, persists across the column-strip grid.
    @pl.when(pl.program_id(0) == 0)
    def _():
        t = jnp.dot(wh_ref[...], x_ref[...], preferred_element_type=jnp.float32)
        tmp_ref[...] = t.astype(tmp_ref.dtype)

    out = jnp.dot(tmp_ref[...], wk_ref[...], preferred_element_type=jnp.float32)
    o_ref[...] = out.astype(o_ref.dtype)


def _pick_col_tile(H, W, C, out_size, n_out, out_dtype):
    """Largest 128-multiple output-column strip that keeps estimated VMEM under budget."""
    out_bytes = np.dtype(out_dtype).itemsize
    fixed = 2 * H * W * C * 2 + 2 * out_size * H * 2 + out_size * W * C * 2

    def total(tn):
        return fixed + 2 * W * C * tn * 2 + 2 * out_size * tn * out_bytes

    if total(n_out) <= _VMEM_BUDGET:
        return n_out
    for tn in (4096, 2048, 1024, 512, 256, 128):
        if tn < n_out and total(tn) <= _VMEM_BUDGET:
            return tn
    return 128


def _resize_pad_pallas(img_hwc, new_h, new_w, out_size, top, left, fill):
    """img_hwc: (H, W, C) float -> (out_size, out_size, C), resize + pad/crop fused."""
    H, W, C = img_hwc.shape
    wh, wk, valid_h, valid_w = _get_weights(H, W, C, new_h, new_w, out_size, top, left)

    x2d = img_hwc.reshape(H, W * C).astype(jnp.bfloat16)   # free reshape, bf16 halves DMA
    n_out = out_size * C
    tn = _pick_col_tile(H, W, C, out_size, n_out, img_hwc.dtype)
    grid = (pl.cdiv(n_out, tn),)

    out2d = pl.pallas_call(
        _resize_kernel,
        out_shape=jax.ShapeDtypeStruct((out_size, n_out), img_hwc.dtype),
        grid=grid,
        in_specs=[
            pl.BlockSpec((H, W * C), lambda j: (0, 0)),       # whole image, grid-invariant
            pl.BlockSpec((out_size, H), lambda j: (0, 0)),    # height weights, invariant
            pl.BlockSpec((W * C, tn), lambda j: (0, j)),      # width-weight column strip
        ],
        out_specs=pl.BlockSpec((out_size, tn), lambda j: (0, j)),
        scratch_shapes=[pltpu.VMEM((out_size, W * C), jnp.bfloat16)],
        compiler_params=pltpu.CompilerParams(
            dimension_semantics=("arbitrary",),               # scratch reused across strips
            vmem_limit_bytes=_VMEM_LIMIT,
        ),
    )(x2d, wh, wk)

    out = out2d.reshape(out_size, out_size, C)               # free reshape back to HWC
    if fill != 0 and (not valid_h.all() or not valid_w.all()):
        mask = jnp.asarray(valid_h)[:, None, None] & jnp.asarray(valid_w)[None, :, None]
        out = jnp.where(mask, out, jnp.asarray(fill, dtype=out.dtype))
    return out


# ----------------------------------------------------------------------------
# Module-equivalent wrapper.
# ----------------------------------------------------------------------------
class ResizeMaxSize:
    def __init__(self, max_size, interpolation="bicubic", fn="max", fill=0):
        if not isinstance(max_size, int):
            raise TypeError("max_size must be int")
        if interpolation != "bicubic":
            raise NotImplementedError("only bicubic interpolation is implemented")
        self.max_size = max_size
        self.interpolation = interpolation
        self.fn = min if fn == "min" else min   # faithful to the source: always `min`
        self.fill = fill

    def __call__(self, img):
        assert img.ndim == 3, "expected HWC image"
        height, width = img.shape[:2]
        scale = self.max_size / self.fn(width, height)
        if scale == 1.0:
            return img
        # Literal spec order: iterate (width, height); F.resize reads the sequence as (h, w).
        new_size = tuple(round(dim * scale) for dim in (width, height))
        new_h, new_w = new_size
        pad_h = self.max_size - new_size[0]   # applied to top/bottom (may be negative: crop)
        pad_w = self.max_size - new_size[1]   # applied to left/right
        top, left = pad_h // 2, pad_w // 2
        return _resize_pad_pallas(img, new_h, new_w, self.max_size, top, left, self.fill)


if __name__ == "__main__":
    key = jax.random.PRNGKey(0)
    C = 4

    # Case 1: square 16x16x4 image, max_size=32 -> pure 2x bicubic upscale, no pad.
    H, W = 16, 16
    img = jax.random.normal(key, (H, W, C), dtype=jnp.float32)
    tfm = ResizeMaxSize(max_size=32, fill=0)
    out = jax.block_until_ready(tfm(img))
    assert out.shape == (32, 32, C), out.shape
    assert out.dtype == jnp.float32
    assert bool(jnp.all(jnp.isfinite(out)))

    # Constant-image invariant: bicubic weight rows sum to 1 -> output stays ~constant.
    const = jnp.full((H, W, C), 3.0, dtype=jnp.float32)
    out_c = jax.block_until_ready(tfm(const))
    assert bool(jnp.all(jnp.abs(out_c - 3.0) < 0.2)), float(jnp.max(jnp.abs(out_c - 3.0)))

    # Case 2: rectangular 8x16x4, max_size=16 -> resize + negative-pad (crop) path.
    img2 = jax.random.normal(jax.random.PRNGKey(1), (8, 16, C), dtype=jnp.float32)
    tfm2 = ResizeMaxSize(max_size=16, fill=0)
    out2 = jax.block_until_ready(tfm2(img2))
    assert out2.shape == (16, 16, C), out2.shape
    assert bool(jnp.all(jnp.isfinite(out2)))

    print("KERNEL_OK")
</pallas_src>

<mosaic_0001>
module attributes {stable_mosaic.version = 11 : i64} {
  func.func @_resize_kernel(%arg0: i32, %arg1: memref<16x64xbf16, #tpu.memory_space<vmem>>, %arg2: memref<32x16xbf16, #tpu.memory_space<vmem>>, %arg3: memref<64x128xbf16, #tpu.memory_space<vmem>>, %arg4: memref<32x128xf32, #tpu.memory_space<vmem>>, %arg5: memref<32x64xbf16, #tpu.memory_space<vmem>>) attributes {dimension_semantics = [#tpu.dimension_semantics<arbitrary>], iteration_bounds = array<i64: 1>, scalar_prefetch = 0 : i64, scratch_operands = 1 : i64, tpu.core_type = #tpu.core_type<tc>, window_params = [{pipeline_mode = #tpu.pipeline_mode<synchronous>, transform_indices = @transform_0, window_bounds = array<i64: 16, 64>}, {pipeline_mode = #tpu.pipeline_mode<synchronous>, transform_indices = @transform_1, window_bounds = array<i64: 32, 16>}, {transform_indices = @transform_2, window_bounds = array<i64: 64, 128>}, {transform_indices = @transform_3, window_bounds = array<i64: 32, 128>}]} {
    %c0_i32 = arith.constant 0 : i32
    %0 = arith.cmpi eq, %arg0, %c0_i32 : i32
    %1 = arith.extui %0 : i1 to i32
    %c0_i32_0 = arith.constant 0 : i32
    %2 = arith.cmpi ne, %1, %c0_i32_0 : i32
    scf.if %2 {
      %c0_6 = arith.constant 0 : index
      %c0_7 = arith.constant 0 : index
      %7 = vector.load %arg2[%c0_6, %c0_7] : memref<32x16xbf16, #tpu.memory_space<vmem>>, vector<32x16xbf16>
      %c0_8 = arith.constant 0 : index
      %c0_9 = arith.constant 0 : index
      %8 = vector.load %arg1[%c0_8, %c0_9] : memref<16x64xbf16, #tpu.memory_space<vmem>>, vector<16x64xbf16>
      %cst_10 = arith.constant dense<0.000000e+00> : vector<32x64xf32>
      %9 = tpu.matmul %7, %8, %cst_10 {dimension_numbers = #tpu.dot_dimension_numbers<[1], [0], [0], [1], [0, 0, 1, 1], [], []>} : vector<32x16xbf16>, vector<16x64xbf16>, vector<32x64xf32> -> vector<32x64xf32>
      %10 = arith.truncf %9 : vector<32x64xf32> to vector<32x64xbf16>
      %c0_11 = arith.constant 0 : index
      %c0_12 = arith.constant 0 : index
      %11 = vector.load %arg5[%c0_11, %c0_12] : memref<32x64xbf16, #tpu.memory_space<vmem>>, vector<32x64xbf16>
      tpu.vector_store %arg5[%c0_11, %c0_12], %10 {strides = array<i32>} : memref<32x64xbf16, #tpu.memory_space<vmem>>, vector<32x64xbf16>,
    } else {
    }
    %c0 = arith.constant 0 : index
    %c0_1 = arith.constant 0 : index
    %3 = vector.load %arg5[%c0, %c0_1] : memref<32x64xbf16, #tpu.memory_space<vmem>>, vector<32x64xbf16>
    %c0_2 = arith.constant 0 : index
    %c0_3 = arith.constant 0 : index
    %4 = vector.load %arg3[%c0_2, %c0_3] : memref<64x128xbf16, #tpu.memory_space<vmem>>, vector<64x128xbf16>
    %cst = arith.constant dense<0.000000e+00> : vector<32x128xf32>
    %5 = tpu.matmul %3, %4, %cst {dimension_numbers = #tpu.dot_dimension_numbers<[1], [0], [0], [1], [0, 0, 1, 1], [], []>} : vector<32x64xbf16>, vector<64x128xbf16>, vector<32x128xf32> -> vector<32x128xf32>
    %c0_4 = arith.constant 0 : index
    %c0_5 = arith.constant 0 : index
    %6 = vector.load %arg4[%c0_4, %c0_5] : memref<32x128xf32, #tpu.memory_space<vmem>>, vector<32x128xf32>
    tpu.vector_store %arg4[%c0_4, %c0_5], %5 {strides = array<i32>} : memref<32x128xf32, #tpu.memory_space<vmem>>, vector<32x128xf32>,
    return
  }
  func.func @transform_0(%arg0: i32) -> (i32, i32) {
    %c0_i32 = arith.constant 0 : i32
    %c0_i32_0 = arith.constant 0 : i32
    %c0_i32_1 = arith.constant 0 : i32
    return %c0_i32, %c0_i32_0 : i32, i32
  }
  func.func @transform_1(%arg0: i32) -> (i32, i32) {
    %c0_i32 = arith.constant 0 : i32
    %c0_i32_0 = arith.constant 0 : i32
    %c0_i32_1 = arith.constant 0 : i32
    return %c0_i32, %c0_i32_0 : i32, i32
  }
  func.func @transform_2(%arg0: i32) -> (i32, i32) {
    %c0_i32 = arith.constant 0 : i32
    %c0_i32_0 = arith.constant 0 : i32
    return %c0_i32, %arg0 : i32, i32
  }
  func.func @transform_3(%arg0: i32) -> (i32, i32) {
    %c0_i32 = arith.constant 0 : i32
    %c0_i32_0 = arith.constant 0 : i32
    return %c0_i32, %arg0 : i32, i32
  }
}

</mosaic_0001>

<bundles_post_ra>
// kernel: tpu_custom_call.1
= control target key start
LH: loop header
LB: loop body
LE: loop exit
PB: predicated region body
PF: predicated region fallthrough
CT: control target
= control target key end

     0   :  { %8 = vsyncpa [#allocation4], 0  ;;  %s386_s0 = inlined_call_operand.vmem [shape: bf16[16,64], index: 0, kind: input, shape index: {}]   ;;  %s387_s1 = inlined_call_operand.vmem [shape: bf16[32,16], index: 1, kind: input, shape index: {}]   ;;  %s388_s2 = inlined_call_operand.hbm [shape: bf16[64,128], index: 2, kind: input, shape index: {}]   ;;  %s389_s3 = inlined_call_operand.hbm [shape: f32[32,128], index: 3, kind: output, shape index: {}]  }
   0x1   :  { %9 = vsyncpa [#allocation5], 0  ;;  %s327_s12 = smov [#allocation3]   ;;  %s279_s16 = scalar_lea.hbm %s388_s2, 512 }
   0x2   :  { %s19_s13 = sshll.u32 %s327_s12, 4  ;;  %p280_p0 = scmp.ne.s32.totalorder %s388_s2, %s279_s16  ;;  %s20_s13 = int_to_ptr.vmem [resolvable:$true] %s19_s13 }
   0x3   :  { %p283_p1 = scmp.lt.u32.totalorder %s279_s16, %s388_s2 }
   0x5   :  { %p285_p2 = pnand %p283_p1, %p280_p0 }
   0x7   :  { %288 = shalt.err (!%p285_p2)
}
   0x8   :  { %s289_s21 = scalar_lea.vmem %s20_s13, 512  ;;  %p294_p4 = scmp.lt.s32.totalorder %s20_s13, %s20_s13 }
   0x9   :  { %p290_p3 = scmp.ne.s32.totalorder %s20_s13, %s289_s21  ;;  %p295_p5 = scmp.lt.s32.totalorder %s289_s21, %s289_s21 }
   0xb   :  { %p296_p6 = por %p295_p5, %p294_p4 }
   0xd   :  { %p297_p7 = pnand %p296_p6, %p290_p3 }
   0xf   :  { %300 = shalt.err (!%p297_p7)
}
  0x10   :  { %s328_s22 = smov 64   ;;  %s329_s23 = smov 4  }
  0x11   :  { %25 = dma.hbm_to_vmem [thread:$0]  %s388_s2, 512, %s20_s13, [#allocation4], %s328_s22, %s328_s22, %s329_s23  }
  0x12   :  { %323 = dma.done.wait [#allocation4], 512  }
  0x13   :  { %324 = vsyncadd [#allocation4], 4294966784  ;;  %v272_v0 = vld [vmem:[%s386_s0] sm:$0xff]   ;;  %vm56_vm0 = vcmask 130048   ;;  %v274_v2 = vld [vmem:[%s387_s1 + $0x8] sm:$0xff]   ;;  %vm114_vm1 = vcmask 523264  }
  0x14   :  { %v273_v1 = vld [vmem:[%s387_s1] sm:$0xff]   ;;  %248 = vmatprep.subr.bf16.mxu0 %v272_v0  ;;  %v275_v3 = vld [vmem:[#allocation3] sm:$0xff]   ;;  %v276_v4 = vld [vmem:[#allocation3 + $0x8] sm:$0xff]   ;;  %s330_s0 = smov [#allocation6]  }
  0x15   :  { %249 = vmatpush3.bf16.msra.mxu0 %v272_v0  ;;  %250 = vmatprep.mubr.msk.bf16.mxu0 %vm56_vm0, %v273_v1  ;;  %v277_v5 = vld [vmem:[#allocation3 + $0x10] sm:$0xff]   ;;  %v278_v6 = vld [vmem:[#allocation3 + $0x18] sm:$0xff]   ;;  %s216_s1 = sshll.u32 %s330_s0, 4  ;;  %s217_s1 = int_to_ptr.vmem [resolvable:$true] %s216_s1 }
  0x16   :  { %254 = vmatprep.subr.bf16.mxu1 %v275_v3  ;;  %s301_s2 = scalar_lea.vmem %s217_s1, 512  ;;  %p306_p9 = scmp.lt.s32.totalorder %s217_s1, %s217_s1 }
  0x17   :  { %255 = vmatpush3.bf16.msra.mxu1 %v275_v3  ;;  %p302_p8 = scmp.ne.s32.totalorder %s217_s1, %s301_s2  ;;  %p307_p10 = scmp.lt.s32.totalorder %s301_s2, %s301_s2 }
  0x18   :  { %251 = vmatmul.mubr.msk.bf16.vlgmr.msra.gmra.mrb[0].mxu0 %vm56_vm0, %v274_v2  ;;  %256 = vmatprep.subr.bf16.mxu1 %v276_v4 }
  0x19   :  { %p308_p11 = por %p307_p10, %p306_p9 }
  0x1b   :  { %257 = vmatpush3.bf16.msra.mxu1 %v276_v4  ;;  %p309_p12 = pnand %p308_p11, %p302_p8 }
  0x1c   :  { %258 = vmatprep.subr.bf16.mxu1 %v277_v5 }
  0x1f   :  { %259 = vmatpush3.bf16.msra.mxu1 %v277_v5 }
  0x20   :  { %260 = vmatprep.subr.bf16.mxu1 %v278_v6 }
  0x23   :  { %261 = vmatpush3.bf16.msra.mxu1 %v278_v6 }
  0xeb   :  { %v252_v7 = vpop.f32.mrb[0].mxu0 }
  0xec   :  { %v97_v8 = vpop.f32.mrb[1].mxu0 }
  0xed   :  { %v253_v9 = vpop.f32.mrb[2].mxu0 }
  0xee   :  { %v113_v10 = vpack.c.bf16 %v253_v9, %v252_v7  ;;  %v100_v11 = vpop.f32.mrb[3].mxu0 }
  0xef   :  { %v112_v12 = vpack.c.bf16 %v100_v11, %v97_v8 }
  0xf0   :  { %116 = vst.msk [vmem:[#allocation2 + $0x8] sm:$0xff] %vm114_vm1, %v113_v10 }
  0xf1   :  { %115 = vst.msk [vmem:[#allocation2] sm:$0xff] %vm114_vm1, %v112_v12 }
  0xf7   :  { %v118_v14 = vld [vmem:[#allocation2 + $0x8] sm:$0xff] }
  0xf8   :  { %v117_v13 = vld [vmem:[#allocation2] sm:$0xff] }
  0xf9   :  { %262 = vmatprep.mubr.msk.bf16.mxu1 %vm114_vm1, %v117_v13 }
  0xfa   :  { %263 = vmatmul.mubr.msk.bf16.vlgmr.msra.gmra.mrb[0].mxu1 %vm114_vm1, %v118_v14 }
 0x1cd   :  { %v264_v15 = vpop.f32.mrb[0].mxu1 }
 0x1ce   :  { %209 = vst [vmem:[#allocation6 + $0x10] sm:$0xff] %v264_v15  ;;  %v192_v16 = vpop.f32.mrb[1].mxu1 }
 0x1cf   :  { %207 = vst [vmem:[#allocation6] sm:$0xff] %v192_v16  ;;  %v265_v17 = vpop.f32.mrb[2].mxu1 }
 0x1d0   :  { %210 = vst [vmem:[#allocation6 + $0x18] sm:$0xff] %v265_v17  ;;  %v195_v18 = vpop.f32.mrb[3].mxu1 }
 0x1d1   :  { %208 = vst [vmem:[#allocation6 + $0x8] sm:$0xff] %v195_v18 }
 0x1d2   :  { %312 = shalt.err (!%p309_p12)
}
 0x1d3   :  { %s313_s7 = scalar_lea.hbm %s389_s3, 512 }
 0x1d4   :  { %p314_p13 = scmp.ne.s32.totalorder %s389_s3, %s313_s7  ;;  %p317_p0 = scmp.lt.u32.totalorder %s313_s7, %s389_s3 }
 0x1d6   :  { %p319_p1 = pnand %p317_p0, %p314_p13 }
 0x1d8   :  { %322 = shalt.err (!%p319_p1)
}
 0x1d9   :  { %s331_s12 = smov 128   ;;  %s332_s13 = smov 8  }
 0x1da   :  { %222 = dma.vmem_to_hbm [thread:$0]  %s217_s1, 512, %s389_s3, [#allocation5], %s331_s12, %s331_s12, %s332_s13  }
 0x1db   :  { %325 = dma.done.wait [#allocation5], 512  }
 0x1dc   :  { %326 = vsyncadd [#allocation5], 4294966784 }
 0x1dd   :  { %226 = vsyncpa [#allocation4], 1 }
 0x1de   :  { %227 = vsyncpa [#allocation5], 1 }

</bundles_post_ra>
